<compile_context>
chip_gen: v7x
topology: tpu7x:2x2x1
jax: 0.10.0
libtpu: 0.0.40
codegen_flags: <defaults>
</compile_context>

<pallas_src>
import functools

import jax
import jax.numpy as jnp
import numpy as np
from jax import lax
from jax.experimental import pallas as pl
from jax.experimental.pallas import tpu as pltpu

EPS = 1e-5  # nn.BatchNorm1d default


def residual_kernel(x_ref, w_ref, p_ref, o_ref, *, B, L):
    # ---- fold batch onto lanes: (B, C, L) -> (C, B*L), pure 128-aligned copies
    if B > 1:
        x = jnp.concatenate([x_ref[b] for b in range(B)], axis=1)
    else:
        x = x_ref[0]
    n = x.shape[1]                                   # B*L lanes
    n_inv = 1.0 / n

    # ---- halo masks, hoisted once and reused by both conv layers
    col = lax.broadcasted_iota(jnp.int32, x.shape, 1) % L
    lmask = col == 0                                 # kills x[l-1] at l == 0
    rmask = col == (L - 1)                           # kills x[l+1] at l == L-1

    def conv_bn(inp, w_mat, gamma, beta):
        # K=3 taps with zero halos (also blocks cross-batch leakage on the
        # folded lane axis), stacked sublane-wise for one im2col MXU matmul.
        left = jnp.where(lmask, 0.0, pltpu.roll(inp, 1, 1))          # x[l-1]
        right = jnp.where(rmask, 0.0, pltpu.roll(inp, n - 1, 1))     # x[l+1]
        xcol = jnp.concatenate([left, inp, right], axis=0)           # (3C, B*L)
        # No conv bias: it is exactly cancelled by the BN mean subtraction.
        h = jnp.dot(w_mat, xcol, preferred_element_type=jnp.float32)

        # Single-pass batch stats over all lanes (= batch*length), biased var.
        mean = jnp.sum(h, axis=1, keepdims=True) * n_inv             # (C, 1)
        var = jnp.sum(h * h, axis=1, keepdims=True) * n_inv - mean * mean
        scale = gamma * lax.rsqrt(var + EPS)                         # EUP rsqrt
        shift = beta - mean * scale                                  # (C, 1) only
        return h * scale + shift                                     # 2 slab ops

    # layer1: Conv -> BN -> ReLU
    h = jnp.maximum(conv_bn(x, w_ref[0], p_ref[0], p_ref[1]), 0.0)
    # layer2: Conv -> BN, residual add, output ReLU
    out = jnp.maximum(conv_bn(h, w_ref[1], p_ref[2], p_ref[3]) + x, 0.0)

    # ---- unfold lanes back to (B, C, L): per-batch full-width (128-lane) stores
    for b in range(B):
        o_ref[b] = out[:, b * L:(b + 1) * L].astype(o_ref.dtype)


def _im2col_weight(w):
    """(C_out, C_in, K) -> (C_out, K*C_in), k-major to match the tap stacking."""
    c_out = w.shape[0]
    return jnp.transpose(w, (0, 2, 1)).reshape(c_out, -1)


def residual_forward(x, params, K=3):
    """x: (B, C, L) float32 (NCL, like nn.Conv1d). Returns (B, C, L) float32."""
    assert K == 3, "kernel is specialized to kernel_size=3, padding=1"
    B, C, L = x.shape

    # Pack the small parameters into two operands (3 input DMAs total).
    w_all = jnp.stack([_im2col_weight(params["w1"]),
                       _im2col_weight(params["w2"])])                # (2, C, 3C)
    p_all = jnp.stack([params["g1"], params["be1"],
                       params["g2"], params["be2"]])                 # (4, C, 1)

    vmem = pl.BlockSpec(memory_space=pltpu.MemorySpace.VMEM)
    return pl.pallas_call(
        functools.partial(residual_kernel, B=B, L=L),
        out_shape=jax.ShapeDtypeStruct((B, C, L), jnp.float32),
        in_specs=[vmem, vmem, vmem],
        out_specs=vmem,
    )(x, w_all, p_all)


def reference_forward(x, params, K=3):
    """Pure-JAX reference matching the PyTorch forward (training-mode BN,
    conv bias included -- BN cancels it, which the kernel exploits)."""
    def conv(x_, w, b):
        out = lax.conv_general_dilated(
            x_, w, window_strides=(1,), padding=[((K - 1) // 2, (K - 1) // 2)],
            dimension_numbers=("NCH", "OIH", "NCH"))
        return out + b[None]

    def bn(h, g, be):
        mean = jnp.mean(h, axis=(0, 2), keepdims=True)
        var = jnp.mean((h - mean) ** 2, axis=(0, 2), keepdims=True)
        return (h - mean) * lax.rsqrt(var + EPS) * g[None] + be[None]

    residual = x
    out = jnp.maximum(bn(conv(x, params["w1"], params["b1"]),
                         params["g1"], params["be1"]), 0.0)
    out = bn(conv(out, params["w2"], params["b2"]), params["g2"], params["be2"])
    out = out + residual
    return jnp.maximum(out, 0.0)


def init_params(key, C, K=3):
    ks = jax.random.split(key, 8)
    scale = 1.0 / np.sqrt(C * K)
    return {
        "w1": jax.random.uniform(ks[0], (C, C, K), jnp.float32, -scale, scale),
        "b1": jax.random.uniform(ks[1], (C, 1), jnp.float32, -scale, scale),
        "g1": 1.0 + 0.1 * jax.random.normal(ks[2], (C, 1), jnp.float32),
        "be1": 0.1 * jax.random.normal(ks[3], (C, 1), jnp.float32),
        "w2": jax.random.uniform(ks[4], (C, C, K), jnp.float32, -scale, scale),
        "b2": jax.random.uniform(ks[5], (C, 1), jnp.float32, -scale, scale),
        "g2": 1.0 + 0.1 * jax.random.normal(ks[6], (C, 1), jnp.float32),
        "be2": 0.1 * jax.random.normal(ks[7], (C, 1), jnp.float32),
    }


if __name__ == "__main__":
    B, C, L, K = 2, 8, 128, 3
    key = jax.random.PRNGKey(0)
    kx, kp = jax.random.split(key)
    x = jax.random.normal(kx, (B, C, L), jnp.float32)
    params = init_params(kp, C, K)

    out = jax.block_until_ready(residual_forward(x, params, K=K))
    ref = jax.block_until_ready(reference_forward(x, params, K=K))
    np.testing.assert_allclose(np.asarray(out), np.asarray(ref), rtol=1e-4, atol=1e-4)

    print("KERNEL_OK")
</pallas_src>

<mosaic_0001>
module attributes {stable_mosaic.version = 11 : i64} {
  func.func @residual_kernel(%arg0: memref<2x8x128xf32, #tpu.memory_space<vmem>>, %arg1: memref<2x8x24xf32, #tpu.memory_space<vmem>>, %arg2: memref<4x8x1xf32, #tpu.memory_space<vmem>>, %arg3: memref<2x8x128xf32, #tpu.memory_space<vmem>>) attributes {dimension_semantics = [], scalar_prefetch = 0 : i64, scratch_operands = 0 : i64, tpu.core_type = #tpu.core_type<tc>} {
    %c0 = arith.constant 0 : index
    %c0_0 = arith.constant 0 : index
    %c0_1 = arith.constant 0 : index
    %0 = vector.load %arg0[%c0, %c0_0, %c0_1] : memref<2x8x128xf32, #tpu.memory_space<vmem>>, vector<1x8x128xf32>
    %1 = vector.shape_cast %0 : vector<1x8x128xf32> to vector<8x128xf32>
    %c1 = arith.constant 1 : index
    %c0_2 = arith.constant 0 : index
    %c0_3 = arith.constant 0 : index
    %2 = vector.load %arg0[%c1, %c0_2, %c0_3] : memref<2x8x128xf32, #tpu.memory_space<vmem>>, vector<1x8x128xf32>
    %3 = vector.shape_cast %2 : vector<1x8x128xf32> to vector<8x128xf32>
    %4 = tpu.concatenate %1, %3 in 1 : vector<8x128xf32>, vector<8x128xf32> -> vector<8x256xf32>
    %5 = tpu.iota {dimensions = array<i32: 1>} : vector<8x256xi32>
    %c128_i32 = arith.constant 128 : i32
    %c0_i32 = arith.constant 0 : i32
    %6 = arith.cmpi eq, %c128_i32, %c0_i32 : i32
    %c1_i32 = arith.constant 1 : i32
    %7 = arith.select %6, %c1_i32, %c128_i32 : i32
    %8 = vector.broadcast %7 : i32 to vector<8x256xi32>
    %9 = arith.remsi %5, %8 : vector<8x256xi32>
    %c0_i32_4 = arith.constant 0 : i32
    %10 = vector.broadcast %c0_i32_4 : i32 to vector<8x256xi32>
    %11 = arith.cmpi ne, %9, %10 : vector<8x256xi32>
    %c0_i32_5 = arith.constant 0 : i32
    %12 = vector.broadcast %c0_i32_5 : i32 to vector<8x256xi32>
    %13 = arith.cmpi slt, %9, %12 : vector<8x256xi32>
    %c0_i32_6 = arith.constant 0 : i32
    %14 = arith.cmpi slt, %7, %c0_i32_6 : i32
    %15 = vector.broadcast %14 : i1 to vector<8x256xi1>
    %16 = vector.broadcast %15 : vector<8x256xi1> to vector<8x256xi1>
    %17 = arith.xori %13, %16 : vector<8x256xi1>
    %18 = arith.andi %17, %11 : vector<8x256xi1>
    %19 = vector.broadcast %7 : i32 to vector<8x256xi32>
    %20 = arith.addi %9, %19 : vector<8x256xi32>
    %21 = arith.select %18, %20, %9 : vector<8x256xi1>, vector<8x256xi32>
    %c0_i32_7 = arith.constant 0 : i32
    %22 = vector.broadcast %c0_i32_7 : i32 to vector<8x256xi32>
    %23 = arith.cmpi eq, %21, %22 : vector<8x256xi32>
    %c127_i32 = arith.constant 127 : i32
    %24 = vector.broadcast %c127_i32 : i32 to vector<8x256xi32>
    %25 = arith.cmpi eq, %21, %24 : vector<8x256xi32>
    %c0_8 = arith.constant 0 : index
    %c0_9 = arith.constant 0 : index
    %c0_10 = arith.constant 0 : index
    %26 = vector.load %arg1[%c0_8, %c0_9, %c0_10] : memref<2x8x24xf32, #tpu.memory_space<vmem>>, vector<1x8x24xf32>
    %27 = vector.shape_cast %26 : vector<1x8x24xf32> to vector<8x24xf32>
    %c0_11 = arith.constant 0 : index
    %c0_12 = arith.constant 0 : index
    %c0_13 = arith.constant 0 : index
    %28 = vector.load %arg2[%c0_11, %c0_12, %c0_13] : memref<4x8x1xf32, #tpu.memory_space<vmem>>, vector<1x8x1xf32>
    %29 = vector.shape_cast %28 : vector<1x8x1xf32> to vector<8x1xf32>
    %c1_14 = arith.constant 1 : index
    %c0_15 = arith.constant 0 : index
    %c0_16 = arith.constant 0 : index
    %30 = vector.load %arg2[%c1_14, %c0_15, %c0_16] : memref<4x8x1xf32, #tpu.memory_space<vmem>>, vector<1x8x1xf32>
    %31 = vector.shape_cast %30 : vector<1x8x1xf32> to vector<8x1xf32>
    %c1_i32_17 = arith.constant 1 : i32
    %32 = tpu.dynamic_rotate %4 by %c1_i32_17 dim 1 : vector<8x256xf32>, i32 -> vector<8x256xf32>
    %cst = arith.constant 0.000000e+00 : f32
    %33 = vector.broadcast %cst : f32 to vector<8x256xf32>
    %34 = arith.select %23, %33, %32 : vector<8x256xi1>, vector<8x256xf32>
    %c255_i32 = arith.constant 255 : i32
    %35 = tpu.dynamic_rotate %4 by %c255_i32 dim 1 : vector<8x256xf32>, i32 -> vector<8x256xf32>
    %cst_18 = arith.constant 0.000000e+00 : f32
    %36 = vector.broadcast %cst_18 : f32 to vector<8x256xf32>
    %37 = arith.select %25, %36, %35 : vector<8x256xi1>, vector<8x256xf32>
    %38 = tpu.concatenate %34, %4, %37 in 0 : vector<8x256xf32>, vector<8x256xf32>, vector<8x256xf32> -> vector<24x256xf32>
    %cst_19 = arith.constant dense<0.000000e+00> : vector<8x256xf32>
    %39 = tpu.matmul %27, %38, %cst_19 {dimension_numbers = #tpu.dot_dimension_numbers<[1], [0], [0], [1], [0, 0, 1, 1], [], []>} : vector<8x24xf32>, vector<24x256xf32>, vector<8x256xf32> -> vector<8x256xf32>
    %cst_20 = arith.constant dense<0.000000e+00> : vector<8xf32>
    %40 = vector.multi_reduction <add>, %39, %cst_20 [1] : vector<8x256xf32> to vector<8xf32>
    %41 = vector.shape_cast %40 : vector<8xf32> to vector<8x1xf32>
    %cst_21 = arith.constant 3.906250e-03 : f32
    %42 = vector.broadcast %cst_21 : f32 to vector<8x1xf32>
    %43 = arith.mulf %41, %42 : vector<8x1xf32>
    %44 = arith.mulf %39, %39 : vector<8x256xf32>
    %cst_22 = arith.constant dense<0.000000e+00> : vector<8xf32>
    %45 = vector.multi_reduction <add>, %44, %cst_22 [1] : vector<8x256xf32> to vector<8xf32>
    %46 = vector.shape_cast %45 : vector<8xf32> to vector<8x1xf32>
    %cst_23 = arith.constant 3.906250e-03 : f32
    %47 = vector.broadcast %cst_23 : f32 to vector<8x1xf32>
    %48 = arith.mulf %46, %47 : vector<8x1xf32>
    %49 = arith.mulf %43, %43 : vector<8x1xf32>
    %50 = arith.subf %48, %49 : vector<8x1xf32>
    %cst_24 = arith.constant 9.99999974E-6 : f32
    %51 = vector.broadcast %cst_24 : f32 to vector<8x1xf32>
    %52 = arith.addf %50, %51 : vector<8x1xf32>
    %53 = math.rsqrt %52 : vector<8x1xf32>
    %54 = arith.mulf %29, %53 : vector<8x1xf32>
    %55 = arith.mulf %43, %54 : vector<8x1xf32>
    %56 = arith.subf %31, %55 : vector<8x1xf32>
    %57 = vector.broadcast %54 : vector<8x1xf32> to vector<8x256xf32>
    %58 = arith.mulf %39, %57 : vector<8x256xf32>
    %59 = vector.broadcast %56 : vector<8x1xf32> to vector<8x256xf32>
    %60 = arith.addf %58, %59 : vector<8x256xf32>
    %cst_25 = arith.constant 0.000000e+00 : f32
    %61 = vector.broadcast %cst_25 : f32 to vector<8x256xf32>
    %62 = arith.maximumf %60, %61 : vector<8x256xf32>
    %c1_26 = arith.constant 1 : index
    %c0_27 = arith.constant 0 : index
    %c0_28 = arith.constant 0 : index
    %63 = vector.load %arg1[%c1_26, %c0_27, %c0_28] : memref<2x8x24xf32, #tpu.memory_space<vmem>>, vector<1x8x24xf32>
    %64 = vector.shape_cast %63 : vector<1x8x24xf32> to vector<8x24xf32>
    %c2 = arith.constant 2 : index
    %c0_29 = arith.constant 0 : index
    %c0_30 = arith.constant 0 : index
    %65 = vector.load %arg2[%c2, %c0_29, %c0_30] : memref<4x8x1xf32, #tpu.memory_space<vmem>>, vector<1x8x1xf32>
    %66 = vector.shape_cast %65 : vector<1x8x1xf32> to vector<8x1xf32>
    %c3 = arith.constant 3 : index
    %c0_31 = arith.constant 0 : index
    %c0_32 = arith.constant 0 : index
    %67 = vector.load %arg2[%c3, %c0_31, %c0_32] : memref<4x8x1xf32, #tpu.memory_space<vmem>>, vector<1x8x1xf32>
    %68 = vector.shape_cast %67 : vector<1x8x1xf32> to vector<8x1xf32>
    %c1_i32_33 = arith.constant 1 : i32
    %69 = tpu.dynamic_rotate %62 by %c1_i32_33 dim 1 : vector<8x256xf32>, i32 -> vector<8x256xf32>
    %cst_34 = arith.constant 0.000000e+00 : f32
    %70 = vector.broadcast %cst_34 : f32 to vector<8x256xf32>
    %71 = arith.select %23, %70, %69 : vector<8x256xi1>, vector<8x256xf32>
    %c255_i32_35 = arith.constant 255 : i32
    %72 = tpu.dynamic_rotate %62 by %c255_i32_35 dim 1 : vector<8x256xf32>, i32 -> vector<8x256xf32>
    %cst_36 = arith.constant 0.000000e+00 : f32
    %73 = vector.broadcast %cst_36 : f32 to vector<8x256xf32>
    %74 = arith.select %25, %73, %72 : vector<8x256xi1>, vector<8x256xf32>
    %75 = tpu.concatenate %71, %62, %74 in 0 : vector<8x256xf32>, vector<8x256xf32>, vector<8x256xf32> -> vector<24x256xf32>
    %cst_37 = arith.constant dense<0.000000e+00> : vector<8x256xf32>
    %76 = tpu.matmul %64, %75, %cst_37 {dimension_numbers = #tpu.dot_dimension_numbers<[1], [0], [0], [1], [0, 0, 1, 1], [], []>} : vector<8x24xf32>, vector<24x256xf32>, vector<8x256xf32> -> vector<8x256xf32>
    %cst_38 = arith.constant dense<0.000000e+00> : vector<8xf32>
    %77 = vector.multi_reduction <add>, %76, %cst_38 [1] : vector<8x256xf32> to vector<8xf32>
    %78 = vector.shape_cast %77 : vector<8xf32> to vector<8x1xf32>
    %cst_39 = arith.constant 3.906250e-03 : f32
    %79 = vector.broadcast %cst_39 : f32 to vector<8x1xf32>
    %80 = arith.mulf %78, %79 : vector<8x1xf32>
    %81 = arith.mulf %76, %76 : vector<8x256xf32>
    %cst_40 = arith.constant dense<0.000000e+00> : vector<8xf32>
    %82 = vector.multi_reduction <add>, %81, %cst_40 [1] : vector<8x256xf32> to vector<8xf32>
    %83 = vector.shape_cast %82 : vector<8xf32> to vector<8x1xf32>
    %cst_41 = arith.constant 3.906250e-03 : f32
    %84 = vector.broadcast %cst_41 : f32 to vector<8x1xf32>
    %85 = arith.mulf %83, %84 : vector<8x1xf32>
    %86 = arith.mulf %80, %80 : vector<8x1xf32>
    %87 = arith.subf %85, %86 : vector<8x1xf32>
    %cst_42 = arith.constant 9.99999974E-6 : f32
    %88 = vector.broadcast %cst_42 : f32 to vector<8x1xf32>
    %89 = arith.addf %87, %88 : vector<8x1xf32>
    %90 = math.rsqrt %89 : vector<8x1xf32>
    %91 = arith.mulf %66, %90 : vector<8x1xf32>
    %92 = arith.mulf %80, %91 : vector<8x1xf32>
    %93 = arith.subf %68, %92 : vector<8x1xf32>
    %94 = vector.broadcast %91 : vector<8x1xf32> to vector<8x256xf32>
    %95 = arith.mulf %76, %94 : vector<8x256xf32>
    %96 = vector.broadcast %93 : vector<8x1xf32> to vector<8x256xf32>
    %97 = arith.addf %95, %96 : vector<8x256xf32>
    %98 = arith.addf %97, %4 : vector<8x256xf32>
    %cst_43 = arith.constant 0.000000e+00 : f32
    %99 = vector.broadcast %cst_43 : f32 to vector<8x256xf32>
    %100 = arith.maximumf %98, %99 : vector<8x256xf32>
    %101 = vector.extract_strided_slice %100 {offsets = [0, 0], sizes = [8, 128], strides = [1, 1]} : vector<8x256xf32> to vector<8x128xf32>
    %c0_44 = arith.constant 0 : index
    %c0_45 = arith.constant 0 : index
    %c0_46 = arith.constant 0 : index
    %102 = vector.load %arg3[%c0_44, %c0_45, %c0_46] : memref<2x8x128xf32, #tpu.memory_space<vmem>>, vector<1x8x128xf32>
    %103 = vector.shape_cast %102 : vector<1x8x128xf32> to vector<8x128xf32>
    %104 = vector.shape_cast %101 : vector<8x128xf32> to vector<1x8x128xf32>
    tpu.vector_store %arg3[%c0_44, %c0_45, %c0_46], %104 {strides = array<i32>} : memref<2x8x128xf32, #tpu.memory_space<vmem>>, vector<1x8x128xf32>,
    %105 = vector.extract_strided_slice %100 {offsets = [0, 128], sizes = [8, 128], strides = [1, 1]} : vector<8x256xf32> to vector<8x128xf32>
    %c1_47 = arith.constant 1 : index
    %c0_48 = arith.constant 0 : index
    %c0_49 = arith.constant 0 : index
    %106 = vector.load %arg3[%c1_47, %c0_48, %c0_49] : memref<2x8x128xf32, #tpu.memory_space<vmem>>, vector<1x8x128xf32>
    %107 = vector.shape_cast %106 : vector<1x8x128xf32> to vector<8x128xf32>
    %108 = vector.shape_cast %105 : vector<8x128xf32> to vector<1x8x128xf32>
    tpu.vector_store %arg3[%c1_47, %c0_48, %c0_49], %108 {strides = array<i32>} : memref<2x8x128xf32, #tpu.memory_space<vmem>>, vector<1x8x128xf32>,
    return
  }
}

</mosaic_0001>

<bundles_post_ra>
// kernel: tpu_custom_call.1
= control target key start
LH: loop header
LB: loop body
LE: loop exit
PB: predicated region body
PF: predicated region fallthrough
CT: control target
= control target key end

     0   :  { %s416_s16 = smov 127   ;;  %v417_v3 = vmov 0.0   ;;  %s551_s0 = inlined_call_operand.vmem [shape: f32[2,8,128], index: 0, kind: input, shape index: {}]   ;;  %s552_s1 = inlined_call_operand.vmem [shape: f32[2,8,24], index: 1, kind: input, shape index: {}]   ;;  %s553_s2 = inlined_call_operand.vmem [shape: f32[4,8,1], index: 2, kind: input, shape index: {}]   ;;  %s554_s3 = inlined_call_operand.hbm [shape: f32[2,8,128], index: 3, kind: output, shape index: {}]  }
   0x1   :  { %v447_v0 = vld [vmem:[%s551_s0] sm:$0xff]  ;;  %v452_v1 = vld [vmem:[%s551_s0 + $0x8] sm:$0xff]  ;;  %139 = vmatprep.mubr.f32.mxu0 %v417_v3 }
   0x2   :  { %v376_v2 = vpack.i.bf16 %v452_v1, %v447_v0  ;;  %64 = vrot.lane.b32.xlu1 %v452_v1, %s416_s16 }
   0x3   :  { %8 = vsyncpa [#allocation3], 0  ;;  %268 = vmatprep.mubr.f32.mxu1 %v417_v3  ;;  %s418_s17 = smov 1   ;;  %v18_v4 = vlaneseq  ;;  %vm419_vm4 = vmmov 1   ;;  %v49_v22 = vld [vmem:[%s552_s1] sm:$0xff]  ;;  %vm71_vm9 = vcmask 195584  }
   0x4   :  { %377 = vrot.lane.b32.xlu0 %v376_v2, %s418_s17  ;;  %v420_v29 = vmov 0   ;;  %v50_v37 = vld [vmem:[%s553_s2] sm:$0xff]  ;;  %v330_v40 = vld [vmem:[%s553_s2 + $0x8] sm:$0xff]  ;;  %s421_s28 = smov [#allocation2]  }
   0x5   :  { %v461_v5 = vand.u32 127, %v18_v4  ;;  %381 = vset.pattern.permute.xlu0 %v420_v29  ;;  %382 = vset.pattern.permute.xlu1 %v420_v29  ;;  %v340_v63 = vld [vmem:[%s552_s1 + $0x8] sm:$0xff]  ;;  %s318_s29 = sshll.u32 %s421_s28, 4  ;;  %s319_s29 = int_to_ptr.vmem [resolvable:$true] %s318_s29 }
   0x6   :  { %p397_p1 = scmp.lt.s32.totalorder %s319_s29, %s319_s29 }
   0x7   :  { %v20_v6 = vadd.s32 128, %v461_v5  ;;  %vm57_vm0 = vcmp.lt.s32.totalorder %v461_v5, 1  ;;  %vm353_vm2 = vcmp.ne.s32.totalorder %v461_v5, 0  ;;  %vm66_vm3 = vcmp.lt.s32.totalorder %v461_v5, 127 }
   0x8   :  { %62 = vrot.lane.b32.xlu0 %v447_v0, %s416_s16  ;;  %vm477_vm6 = vmpackc.low %vm419_vm4, %vm353_vm2  ;;  %vm355_vm8 = vcmp.ne.s32.totalorder %v461_v5, 127  ;;  %v341_v5 = vld [vmem:[%s553_s2 + $0x10] sm:$0xff] }
   0x9   :  { %v32_v7 = vand.u32 127, %v20_v6 }
   0xb   :  { %vm352_vm1 = vcmp.ne.s32.totalorder %v32_v7, 0  ;;  %vm483_vm7 = vcmp.ne.s32.totalorder %v32_v7, 127 }
   0xc   :  { %vm469_vm5 = vmpackc.low %vm419_vm4, %vm352_vm1 }
  0x74   :  { %v65_v11 = vpop.permute.xlu1 %64 }
  0x76   :  { %v378_v8 = vpop.permute.xlu0 %377 }
  0x77   :  { %v380_v9 = vunpack.i.h.bf16 %v378_v8  ;;  %v379_v10 = vunpack.i.l.bf16 %v378_v8 }
  0x79   :  { %v58_v12 = vsel %vm57_vm0, %v379_v10, %v380_v9  ;;  %v59_v14 = vsel %vm57_vm0, %v380_v9, %v379_v10 }
  0x7a   :  { %v356_v15 = vpack.c.bf16 %v452_v1, %v58_v12  ;;  %v359_v16 = vpack.c.bf16 %v447_v0, %v59_v14  ;;  %v63_v18 = vpop.permute.xlu0 %62 }
  0x7b   :  { %v68_v19 = vsel %vm66_vm3, %v65_v11, %v63_v18  ;;  %v67_v21 = vsel %vm66_vm3, %v63_v18, %v65_v11  ;;  %v342_v18 = vld [vmem:[%s553_s2 + $0x18] sm:$0xff]  ;;  %s392_s2 = scalar_lea.vmem %s319_s29, 256 }
  0x7c   :  { %358 = vmatprep.subr.msk.bf16.mxu0 %vm469_vm5, %v356_v15  ;;  %p393_p0 = scmp.ne.s32.totalorder %s319_s29, %s392_s2  ;;  %p398_p2 = scmp.lt.s32.totalorder %s392_s2, %s392_s2 }
  0x7d   :  { %361 = vmatpush1.bf16.msk.msra.mxu0 %vm477_vm6, %v359_v16 }
  0x7e   :  { %336 = vmatprep.subr.msk.mxu0 %vm483_vm7, %v68_v19  ;;  %p399_p3 = por %p398_p2, %p397_p1 }
  0x80   :  { %p400_p4 = pnand %p399_p3, %p393_p0 }
  0x81   :  { %338 = vmatpush1.msk.msra.mxu0 %vm355_vm8, %v67_v21 }
  0x82   :  { %339 = vmatmul.mubr.msk.f32.vlgmr.msra.gmra.mrb[0].mxu0 %vm71_vm9, %v49_v22 }
 0x155   :  { %v141_v23 = vpop.f32.mrb[0].mxu0 }
 0x156   :  { %v143_v24 = vpop.f32.mrb[1].mxu0  ;;  %v150_v25 = vmul.f32 %v141_v23, %v141_v23 }
 0x157   :  { %v151_v26 = vmul.f32 %v143_v24, %v143_v24  ;;  %v146_v27 = vadd.f32 %v143_v24, %v141_v23 }
 0x159   :  { %147 = vadd.xlane.f32.xlu1 %v146_v27  ;;  %v152_v28 = vadd.f32 %v151_v26, %v150_v25 }
 0x15b   :  { %153 = vadd.xlane.f32.xlu0 %v152_v28 }
 0x1e6   :  { %v148_v30 = vpop.xlane.xlu1 %147 }
 0x1e7   :  { %v149_v31 = vmul.f32 0.00390625, %v148_v30 }
 0x1e8   :  { %v154_v32 = vpop.xlane.xlu0 %153 }
 0x1e9   :  { %v156_v33 = vmul.f32 %v149_v31, %v149_v31  ;;  %v155_v34 = vmul.f32 0.00390625, %v154_v32 }
 0x1eb   :  { %v157_v35 = vsub.f32 %v155_v34, %v156_v33 }
 0x1ed   :  { %v158_v36 = vadd.f32 1e-05, %v157_v35 }
 0x1ef   :  { %388 = vrsqrt.f32 %v158_v36 }
 0x1f9   :  { %v389_v38 = vpop.eup %388 }
 0x1fa   :  { %v160_v39 = vmul.f32 %v389_v38, %v50_v37 }
 0x1fc   :  { %165 = vperm.xlu0 %381, %v160_v39   ;;  %v161_v41 = vmul.f32 %v160_v39, %v149_v31 }
 0x1fe   :  { %v162_v42 = vsub.f32 %v330_v40, %v161_v41 }
 0x200   :  { %172 = vperm.xlu1 %382, %v162_v42  }
 0x27b   :  { %v166_v43 = vpop.permute.xlu0 %165 }
 0x27c   :  { %v168_v44 = vmul.f32 %v166_v43, %v141_v23  ;;  %v169_v45 = vmul.f32 %v166_v43, %v143_v24 }
 0x27f   :  { %v173_v46 = vpop.permute.xlu1 %172 }
 0x280   :  { %v175_v47 = vadd.f32 %v173_v46, %v168_v44  ;;  %v176_v48 = vadd.f32 %v173_v46, %v169_v45 }
 0x282   :  { %v177_v49 = vmax.f32 %v175_v47, 0.0  ;;  %v178_v50 = vmax.f32 %v176_v48, 0.0 }
 0x284   :  { %v383_v51 = vpack.i.bf16 %v178_v50, %v177_v49 }
 0x286   :  { %384 = vrot.lane.b32.xlu1 %v383_v51, %s418_s17 }
 0x28a   :  { %193 = vrot.lane.b32.xlu1 %v177_v49, %s416_s16 }
 0x28e   :  { %195 = vrot.lane.b32.xlu1 %v178_v50, %s416_s16 }
 0x2f8   :  { %v385_v52 = vpop.permute.xlu1 %384 }
 0x2f9   :  { %v387_v53 = vunpack.i.h.bf16 %v385_v52  ;;  %v386_v54 = vunpack.i.l.bf16 %v385_v52 }
 0x2fb   :  { %v189_v55 = vsel %vm57_vm0, %v386_v54, %v387_v53  ;;  %v190_v56 = vsel %vm57_vm0, %v387_v53, %v386_v54 }
 0x2fc   :  { %v194_v57 = vpop.permute.xlu1 %193  ;;  %v362_v58 = vpack.c.bf16 %v178_v50, %v189_v55  ;;  %v365_v59 = vpack.c.bf16 %v177_v49, %v190_v56 }
 0x2fe   :  { %364 = vmatprep.subr.msk.bf16.mxu1 %vm469_vm5, %v362_v58 }
 0x2ff   :  { %367 = vmatpush1.bf16.msk.msra.mxu1 %vm477_vm6, %v365_v59 }
 0x300   :  { %v196_v60 = vpop.permute.xlu1 %195 }
 0x301   :  { %v197_v61 = vsel %vm66_vm3, %v194_v57, %v196_v60  ;;  %v198_v62 = vsel %vm66_vm3, %v196_v60, %v194_v57 }
 0x302   :  { %348 = vmatprep.subr.msk.mxu1 %vm483_vm7, %v198_v62 }
 0x303   :  { %350 = vmatpush1.msk.msra.mxu1 %vm355_vm8, %v197_v61 }
 0x304   :  { %351 = vmatmul.mubr.msk.f32.vlgmr.msra.gmra.mrb[0].mxu1 %vm71_vm9, %v340_v63 }
 0x3d7   :  { %v270_v2 = vpop.f32.mrb[0].mxu1 }
 0x3d8   :  { %v272_v3 = vpop.f32.mrb[1].mxu1  ;;  %v279_v4 = vmul.f32 %v270_v2, %v270_v2 }
 0x3d9   :  { %v280_v6 = vmul.f32 %v272_v3, %v272_v3  ;;  %v275_v7 = vadd.f32 %v272_v3, %v270_v2 }
 0x3db   :  { %276 = vadd.xlane.f32.xlu1 %v275_v7  ;;  %v281_v8 = vadd.f32 %v280_v6, %v279_v4 }
 0x3dd   :  { %282 = vadd.xlane.f32.xlu0 %v281_v8 }
 0x468   :  { %v277_v9 = vpop.xlane.xlu1 %276 }
 0x469   :  { %v278_v10 = vmul.f32 0.00390625, %v277_v9 }
 0x46a   :  { %v283_v11 = vpop.xlane.xlu0 %282 }
 0x46b   :  { %v285_v12 = vmul.f32 %v278_v10, %v278_v10  ;;  %v284_v13 = vmul.f32 0.00390625, %v283_v11 }
 0x46d   :  { %v286_v14 = vsub.f32 %v284_v13, %v285_v12 }
 0x46f   :  { %v287_v15 = vadd.f32 1e-05, %v286_v14 }
 0x471   :  { %390 = vrsqrt.f32 %v287_v15 }
 0x47b   :  { %v391_v16 = vpop.eup %390 }
 0x47c   :  { %v289_v17 = vmul.f32 %v391_v16, %v341_v5 }
 0x47e   :  { %294 = vperm.xlu1 %382, %v289_v17   ;;  %v290_v19 = vmul.f32 %v289_v17, %v278_v10 }
 0x480   :  { %v291_v20 = vsub.f32 %v342_v18, %v290_v19 }
 0x482   :  { %301 = vperm.xlu0 %381, %v291_v20  }
 0x4fd   :  { %v295_v21 = vpop.permute.xlu1 %294 }
 0x4fe   :  { %v297_v22 = vmul.f32 %v295_v21, %v270_v2  ;;  %v298_v23 = vmul.f32 %v295_v21, %v272_v3 }
 0x501   :  { %v302_v24 = vpop.permute.xlu0 %301 }
 0x502   :  { %v304_v25 = vadd.f32 %v302_v24, %v297_v22  ;;  %v305_v26 = vadd.f32 %v302_v24, %v298_v23 }
 0x504   :  { %v306_v27 = vadd.f32 %v304_v25, %v447_v0  ;;  %v307_v28 = vadd.f32 %v452_v1, %v305_v26 }
 0x506   :  { %v308_v29 = vmax.f32 %v306_v27, 0.0  ;;  %v309_v30 = vmax.f32 %v307_v28, 0.0 }
 0x508   :  { %310 = vst [vmem:[#allocation2] sm:$0xff] %v308_v29  ;;  %312 = vst [vmem:[#allocation2 + $0x8] sm:$0xff] %v309_v30 }
 0x509   :  { %403 = shalt.err (!%p400_p4)
}
 0x50a   :  { %s404_s5 = scalar_lea.hbm %s554_s3, 256 }
 0x50b   :  { %p405_p5 = scmp.ne.s32.totalorder %s554_s3, %s404_s5  ;;  %p408_p6 = scmp.lt.u32.totalorder %s404_s5, %s554_s3 }
 0x50d   :  { %p410_p7 = pnand %p408_p6, %p405_p5 }
 0x50f   :  { %413 = shalt.err (!%p410_p7)
}
 0x510   :  { %s422_s10 = smov 128   ;;  %s423_s11 = smov 8  }
 0x511   :  { %324 = dma.vmem_to_hbm [thread:$0]  %s319_s29, 256, %s554_s3, [#allocation3], %s422_s10, %s422_s10, %s423_s11  }
 0x512   :  { %414 = dma.done.wait [#allocation3], 256  }
 0x513   :  { %415 = vsyncadd [#allocation3], 4294967040 }
 0x514   :  { %328 = vsyncpa [#allocation3], 1 }

</bundles_post_ra>
